<compile_context>
chip_gen: v7x
topology: tpu7x:2x2x1
jax: 0.10.0
libtpu: 0.0.40
codegen_flags: <defaults>
</compile_context>

<pallas_src>
import functools

import jax
import jax.numpy as jnp
from jax.experimental import pallas as pl
from jax.experimental.pallas import tpu as pltpu

FILTER_PATTERNS = {
    'smooth':      [1.0, -0.5, 0.1, -0.02, 0.004, -0.0008, 0.00015],
    'butterworth': [1.0, -0.6, 0.2, -0.05, 0.01, -0.002, 0.0003],
    'gaussian':    [1.0, -0.7, 0.15, -0.03, 0.005, -0.0007, 8e-05],
    'golden_036':  [1.0, -0.36, 0.1296, -0.22, 0.1564, -0.088, 0.0548],
}


def get_filter_coefficients(filter_name, order=None):
    if filter_name not in FILTER_PATTERNS:
        filter_name = 'smooth'
    coeffs = list(FILTER_PATTERNS[filter_name])
    if order is not None:
        if len(coeffs) > order + 1:
            coeffs = coeffs[:order + 1]
        elif len(coeffs) < order + 1:
            coeffs = coeffs + [0.0] * (order + 1 - len(coeffs))
    return jnp.asarray(coeffs, dtype=jnp.float32)


def _spectral_filter_kernel(scale_ref, coeffs_ref, eig_ref, out_ref, *, n_coeffs):
    # scale_ref : SMEM (1,)        float32 = 2 / (global_max + 1e-8)  (scalar prefetch)
    # coeffs_ref: SMEM (n_coeffs,) float32                            (scalar prefetch)
    # eig_ref / out_ref: VMEM (tile_r, 128) float32 tiles
    x = eig_ref[...] * scale_ref[0] - 1.0

    if n_coeffs == 1:
        result = jnp.full_like(x, coeffs_ref[0])
    else:
        # Clenshaw recurrence for sum_k c_k T_k(x); statically unrolled.
        m = n_coeffs - 1
        two_x = 2.0 * x                 # hoisted; DCE'd if m < 2
        b1 = coeffs_ref[m]              # scalar; broadcasts on first use
        b2 = 0.0
        for k in range(m - 1, 0, -1):
            b1, b2 = two_x * b1 - b2 + coeffs_ref[k], b1
        # Fused series init: result = c0 + x*b1 - b2
        result = coeffs_ref[0] + x * b1 - b2

    # sigmoid(r) == 0.5*tanh(0.5*r) + 0.5 exactly; tanh goes to the EUP
    # (free bundle slot) instead of the VALU-heavy logistic/divide lowering.
    out_ref[...] = 0.5 * jnp.tanh(0.5 * result) + (0.5 + 1e-6)


def _xla_reference(eigenvalues, coeffs):
    """Fused XLA expression, bit-for-bit the PyTorch forward (small-N path / check)."""
    max_eig = jnp.max(eigenvalues) + 1e-8
    x = 2.0 * (eigenvalues / max_eig) - 1.0
    result = coeffs[0] * jnp.ones_like(x)
    if coeffs.shape[0] > 1:
        T_prev = jnp.ones_like(x)
        T_curr = x
        result = result + coeffs[1] * T_curr
        for i in range(2, coeffs.shape[0]):
            T_next = 2.0 * x * T_curr - T_prev
            result = result + coeffs[i] * T_next
            T_prev, T_curr = T_curr, T_next
    return jax.nn.sigmoid(result) + 1e-6


def universal_spectral_filter(eigenvalues, coeffs, *, tile_r=2048,
                              small_n_threshold=65536):
    """eigenvalues: float32 (N,) any N; coeffs: float32 (order+1,)."""
    eigenvalues = eigenvalues.astype(jnp.float32)
    coeffs = coeffs.astype(jnp.float32)
    n = eigenvalues.shape[0]
    n_coeffs = coeffs.shape[0]

    # Below ~64K elements the pallas_call is pure fixed cost; a fused XLA
    # elementwise op is strictly faster there.
    if n < small_n_threshold:
        return _xla_reference(eigenvalues, coeffs)

    # Lane-dense layout: rows of 128 lanes.  Pad rows only to a multiple of 8
    # sublanes (<= 3.5 KiB) -- NOT to a multiple of tile_r; the ragged last
    # grid block is masked by Pallas and the tail is sliced off below.
    rows = pl.cdiv(n, 128)
    rows = ((rows + 7) // 8) * 8
    n_padded = rows * 128
    tile_r = max(8, (min(tile_r, rows) // 8) * 8)
    grid = (pl.cdiv(rows, tile_r),)

    if n_padded == n:
        eig2d = eigenvalues.reshape(rows, 128)       # layout-free, no pad copy
    else:
        # Pad with -inf so max(padded) == max(original) EXACTLY for any input
        # sign.  The padded tail flows through the kernel as garbage (possibly
        # NaN) but is never reduced over and is sliced off below.
        eig2d = jnp.pad(eigenvalues, (0, n_padded - n),
                        constant_values=-jnp.inf).reshape(rows, 128)

    # Global normalization scale: one XLA reduce over the (already materialized)
    # padded buffer, so it fuses with the pad/reshape producer pass; passed to
    # the kernel as an SMEM scalar-prefetch value.
    scale = jnp.reshape(2.0 / (jnp.max(eig2d) + 1e-8), (1,)).astype(jnp.float32)

    cost = pl.CostEstimate(
        flops=25 * n_padded,
        transcendentals=n_padded,
        bytes_accessed=2 * 4 * n_padded,
    )

    out2d = pl.pallas_call(
        functools.partial(_spectral_filter_kernel, n_coeffs=n_coeffs),
        out_shape=jax.ShapeDtypeStruct((rows, 128), jnp.float32),
        grid_spec=pltpu.PrefetchScalarGridSpec(
            num_scalar_prefetch=2,                       # scale, coeffs -> SMEM
            grid=grid,
            in_specs=[pl.BlockSpec((tile_r, 128), lambda i, scale, coeffs: (i, 0))],
            out_specs=pl.BlockSpec((tile_r, 128), lambda i, scale, coeffs: (i, 0)),
        ),
        compiler_params=pltpu.CompilerParams(
            dimension_semantics=("parallel",),           # v7x: shard grid over 2 TCs
            vmem_limit_bytes=32 * 1024 * 1024,
        ),
        cost_estimate=cost,
    )(scale, coeffs, eig2d)

    return out2d.reshape(n_padded)[:n]


if __name__ == "__main__":
    filter_order = 6
    init_filter_name = "smooth"
    coeffs = get_filter_coefficients(init_filter_name, order=filter_order)

    key = jax.random.PRNGKey(0)
    k1, k2 = jax.random.split(key)

    # Case A: 128*8-aligned length -> pad-free reshape path, single grid step.
    # Eigenvalues of a normalized-Laplacian-like operator: non-negative.
    eig_a = jax.random.uniform(k1, (1024,), dtype=jnp.float32,
                               minval=0.0, maxval=2.0)
    out_a = jax.block_until_ready(
        universal_spectral_filter(eig_a, coeffs, small_n_threshold=0))
    ref_a = _xla_reference(eig_a, coeffs)
    assert out_a.shape == eig_a.shape and out_a.dtype == jnp.float32
    assert jnp.allclose(out_a, ref_a, atol=1e-5, rtol=1e-5)

    # Case B: non-128-aligned length, multi-step grid with a ragged last block
    # (tiny tile_r to exercise the masked-tail path).
    eig_b = jax.random.uniform(k2, (3000,), dtype=jnp.float32,
                               minval=0.0, maxval=2.0)
    out_b = jax.block_until_ready(
        universal_spectral_filter(eig_b, coeffs, tile_r=16, small_n_threshold=0))
    ref_b = _xla_reference(eig_b, coeffs)
    assert out_b.shape == eig_b.shape
    assert jnp.allclose(out_b, ref_b, atol=1e-5, rtol=1e-5)

    # Case C: default small-N fast path (fused XLA, identical semantics).
    out_c = jax.block_until_ready(universal_spectral_filter(eig_a, coeffs))
    assert jnp.allclose(out_c, ref_a, atol=1e-6, rtol=1e-6)

    print("KERNEL_OK")
</pallas_src>

<mosaic_0001>
module attributes {stable_mosaic.version = 11 : i64} {
  func.func @_spectral_filter_kernel(%arg0: i32, %arg1: memref<1xf32, #tpu.memory_space<smem>>, %arg2: memref<7xf32, #tpu.memory_space<smem>>, %arg3: memref<8x128xf32, #tpu.memory_space<vmem>>, %arg4: memref<8x128xf32, #tpu.memory_space<vmem>>) attributes {dimension_semantics = [#tpu.dimension_semantics<parallel>], iteration_bounds = array<i64: 1>, scalar_prefetch = 2 : i64, scratch_operands = 0 : i64, tpu.core_type = #tpu.core_type<tc>, window_params = [{transform_indices = @transform_0, window_bounds = array<i64: 8, 128>}, {transform_indices = @transform_1, window_bounds = array<i64: 8, 128>}]} {
    %c0 = arith.constant 0 : index
    %c0_0 = arith.constant 0 : index
    %0 = vector.load %arg3[%c0, %c0_0] : memref<8x128xf32, #tpu.memory_space<vmem>>, vector<8x128xf32>
    %c0_1 = arith.constant 0 : index
    %1 = memref.load %arg1[%c0_1] : memref<1xf32, #tpu.memory_space<smem>>
    %2 = vector.broadcast %1 : f32 to vector<8x128xf32>
    %3 = arith.mulf %0, %2 : vector<8x128xf32>
    %cst = arith.constant 1.000000e+00 : f32
    %4 = vector.broadcast %cst : f32 to vector<8x128xf32>
    %5 = arith.subf %3, %4 : vector<8x128xf32>
    %cst_2 = arith.constant 2.000000e+00 : f32
    %6 = vector.broadcast %cst_2 : f32 to vector<8x128xf32>
    %7 = arith.mulf %6, %5 : vector<8x128xf32>
    %c6 = arith.constant 6 : index
    %8 = memref.load %arg2[%c6] : memref<7xf32, #tpu.memory_space<smem>>
    %9 = vector.broadcast %8 : f32 to vector<8x128xf32>
    %10 = arith.mulf %7, %9 : vector<8x128xf32>
    %cst_3 = arith.constant 0.000000e+00 : f32
    %11 = vector.broadcast %cst_3 : f32 to vector<8x128xf32>
    %12 = arith.subf %10, %11 : vector<8x128xf32>
    %c5 = arith.constant 5 : index
    %13 = memref.load %arg2[%c5] : memref<7xf32, #tpu.memory_space<smem>>
    %14 = vector.broadcast %13 : f32 to vector<8x128xf32>
    %15 = arith.addf %12, %14 : vector<8x128xf32>
    %16 = arith.mulf %7, %15 : vector<8x128xf32>
    %17 = vector.broadcast %8 : f32 to vector<8x128xf32>
    %18 = arith.subf %16, %17 : vector<8x128xf32>
    %c4 = arith.constant 4 : index
    %19 = memref.load %arg2[%c4] : memref<7xf32, #tpu.memory_space<smem>>
    %20 = vector.broadcast %19 : f32 to vector<8x128xf32>
    %21 = arith.addf %18, %20 : vector<8x128xf32>
    %22 = arith.mulf %7, %21 : vector<8x128xf32>
    %23 = arith.subf %22, %15 : vector<8x128xf32>
    %c3 = arith.constant 3 : index
    %24 = memref.load %arg2[%c3] : memref<7xf32, #tpu.memory_space<smem>>
    %25 = vector.broadcast %24 : f32 to vector<8x128xf32>
    %26 = arith.addf %23, %25 : vector<8x128xf32>
    %27 = arith.mulf %7, %26 : vector<8x128xf32>
    %28 = arith.subf %27, %21 : vector<8x128xf32>
    %c2 = arith.constant 2 : index
    %29 = memref.load %arg2[%c2] : memref<7xf32, #tpu.memory_space<smem>>
    %30 = vector.broadcast %29 : f32 to vector<8x128xf32>
    %31 = arith.addf %28, %30 : vector<8x128xf32>
    %32 = arith.mulf %7, %31 : vector<8x128xf32>
    %33 = arith.subf %32, %26 : vector<8x128xf32>
    %c1 = arith.constant 1 : index
    %34 = memref.load %arg2[%c1] : memref<7xf32, #tpu.memory_space<smem>>
    %35 = vector.broadcast %34 : f32 to vector<8x128xf32>
    %36 = arith.addf %33, %35 : vector<8x128xf32>
    %c0_4 = arith.constant 0 : index
    %37 = memref.load %arg2[%c0_4] : memref<7xf32, #tpu.memory_space<smem>>
    %38 = arith.mulf %5, %36 : vector<8x128xf32>
    %39 = vector.broadcast %37 : f32 to vector<8x128xf32>
    %40 = arith.addf %39, %38 : vector<8x128xf32>
    %41 = arith.subf %40, %31 : vector<8x128xf32>
    %cst_5 = arith.constant 5.000000e-01 : f32
    %42 = vector.broadcast %cst_5 : f32 to vector<8x128xf32>
    %43 = arith.mulf %42, %41 : vector<8x128xf32>
    %44 = math.tanh %43 : vector<8x128xf32>
    %cst_6 = arith.constant 5.000000e-01 : f32
    %45 = vector.broadcast %cst_6 : f32 to vector<8x128xf32>
    %46 = arith.mulf %45, %44 : vector<8x128xf32>
    %cst_7 = arith.constant 5.000010e-01 : f32
    %47 = vector.broadcast %cst_7 : f32 to vector<8x128xf32>
    %48 = arith.addf %46, %47 : vector<8x128xf32>
    %c0_8 = arith.constant 0 : index
    %c0_9 = arith.constant 0 : index
    %49 = vector.load %arg4[%c0_8, %c0_9] : memref<8x128xf32, #tpu.memory_space<vmem>>, vector<8x128xf32>
    tpu.vector_store %arg4[%c0_8, %c0_9], %48 {strides = array<i32>} : memref<8x128xf32, #tpu.memory_space<vmem>>, vector<8x128xf32>,
    return
  }
  func.func @transform_0(%arg0: i32, %arg1: memref<1xf32, #tpu.memory_space<smem>>, %arg2: memref<7xf32, #tpu.memory_space<smem>>) -> (i32, i32) {
    %c0_i32 = arith.constant 0 : i32
    %c0_i32_0 = arith.constant 0 : i32
    return %arg0, %c0_i32 : i32, i32
  }
  func.func @transform_1(%arg0: i32, %arg1: memref<1xf32, #tpu.memory_space<smem>>, %arg2: memref<7xf32, #tpu.memory_space<smem>>) -> (i32, i32) {
    %c0_i32 = arith.constant 0 : i32
    %c0_i32_0 = arith.constant 0 : i32
    return %arg0, %c0_i32 : i32, i32
  }
}

</mosaic_0001>

<bundles_post_ra>
// kernel: tpu_custom_call.1
= control target key start
LH: loop header
LB: loop body
LE: loop exit
PB: predicated region body
PF: predicated region fallthrough
CT: control target
= control target key end

     0   :  { %s214_s0 = inlined_call_operand.<no memory space> [shape: f32[1], index: 0, kind: input, shape index: {}]   ;;  %s215_s1 = inlined_call_operand.vmem [shape: f32[7], index: 1, kind: input, shape index: {}]   ;;  %s216_s2 = inlined_call_operand.hbm [shape: f32[8,128], index: 2, kind: input, shape index: {}]   ;;  %s217_s3 = inlined_call_operand.hbm [shape: f32[8,128], index: 3, kind: output, shape index: {}]  }
   0x1   :  { %s9_s14 = sshll.u32 %s215_s1, 4  ;;  %s10_s14 = int_to_ptr.vmem [resolvable:$true] %s9_s14 }
   0x2   :  { %s99_s15 = scalar_lea.vmem %s10_s14, 16  ;;  %p104_p1 = scmp.lt.s32.totalorder %s10_s14, %s10_s14 }
   0x3   :  { %p100_p0 = scmp.ne.s32.totalorder %s10_s14, %s99_s15  ;;  %p105_p2 = scmp.lt.s32.totalorder %s99_s15, %s99_s15 }
   0x5   :  { %p106_p3 = por %p105_p2, %p104_p1 }
   0x7   :  { %p107_p4 = pnand %p106_p3, %p100_p0 }
   0x9   :  { %110 = shalt.err (!%p107_p4)  }
   0xa   :  { %s161_s16 = smov [#allocation4]  }
   0xb   :  { %12 = dma.vmem_to_smem %s10_s14, 16, %s161_s16, [#allocation2] }
   0xc   :  { %155 = dma.done.wait [#allocation2], 16 }
   0xd   :  { %156 = vsyncadd [#allocation2], 4294967280 }
   0xe   :  { %14 = sfence }
   0xf   :  { %15 = vsyncpa [#allocation6], 0 }
  0x10   :  { %16 = vsyncpa [#allocation7], 0  ;;  %s162_s17 = smov [#allocation5]   ;;  %s111_s20 = scalar_lea.hbm %s216_s2, 128 }
  0x11   :  { %s23_s18 = sshll.u32 %s162_s17, 4  ;;  %p112_p5 = scmp.ne.s32.totalorder %s216_s2, %s111_s20  ;;  %s24_s18 = int_to_ptr.vmem [resolvable:$true] %s23_s18 }
  0x12   :  { %p115_p6 = scmp.lt.u32.totalorder %s111_s20, %s216_s2 }
  0x14   :  { %p117_p7 = pnand %p115_p6, %p112_p5 }
  0x16   :  { %120 = shalt.err (!%p117_p7)
}
  0x17   :  { %s121_s25 = scalar_lea.vmem %s24_s18, 128  ;;  %p126_p9 = scmp.lt.s32.totalorder %s24_s18, %s24_s18 }
  0x18   :  { %p122_p8 = scmp.ne.s32.totalorder %s24_s18, %s121_s25  ;;  %p127_p10 = scmp.lt.s32.totalorder %s121_s25, %s121_s25 }
  0x1a   :  { %p128_p11 = por %p127_p10, %p126_p9 }
  0x1c   :  { %p129_p12 = pnand %p128_p11, %p122_p8 }
  0x1e   :  { %132 = shalt.err (!%p129_p12)
}
  0x1f   :  { %26 = dma.hbm_to_vmem [thread:$0]  %s216_s2, 128, %s24_s18, [#allocation6]  }
  0x20   :  { %157 = dma.done.wait [#allocation6], 128  }
  0x21   :  { %158 = vsyncadd [#allocation6], 4294967168  ;;  %s88_s28 = sld [smem:[#allocation4 + $0x6]]  ;;  %v32_v0 = vstv %s214_s0  ;;  %s89_s4 = sld [smem:[#allocation4 + $0x5]]  ;;  %v30_v1 = vld [vmem:[#allocation5] sm:$0xff] }
  0x22   :  { %v33_v2 = vmul.f32 %v32_v0, %v30_v1  ;;  %s90_s5 = sld [smem:[#allocation4 + $0x4]]  ;;  %s91_s6 = sld [smem:[#allocation4 + $0x3]] }
  0x23   :  { %s92_s2 = sld [smem:[#allocation4 + $0x2]]  ;;  %s93_s0 = sld [smem:[#allocation4 + $0x1]] }
  0x24   :  { %v87_v3 = vadd.f32 -1.0, %v33_v2  ;;  %s62_s7 = sld [smem:[#allocation4]]  ;;  %s163_s8 = smov [#allocation8]  }
  0x25   :  { %s78_s9 = sshll.u32 %s163_s8, 4  ;;  %s79_s9 = int_to_ptr.vmem [resolvable:$true] %s78_s9 }
  0x26   :  { %v35_v5 = vmul.f32 2.0, %v87_v3  ;;  %s133_s10 = scalar_lea.vmem %s79_s9, 128  ;;  %p138_p0 = scmp.lt.s32.totalorder %s79_s9, %s79_s9 }
  0x27   :  { %v37_v4 = vstv %s88_s28  ;;  %v40_v6 = vstv %s89_s4  ;;  %p134_p13 = scmp.ne.s32.totalorder %s79_s9, %s133_s10  ;;  %p139_p1 = scmp.lt.s32.totalorder %s133_s10, %s133_s10 }
  0x28   :  { %v38_v7 = vmul.f32 %v37_v4, %v35_v5  ;;  %v45_v10 = vstv %s90_s5  ;;  %v50_v14 = vstv %s91_s6 }
  0x29   :  { %v55_v18 = vstv %s92_s2  ;;  %v60_v22 = vstv %s93_s0  ;;  %p140_p2 = por %p139_p1, %p138_p0 }
  0x2a   :  { %v41_v8 = vadd.f32 %v40_v6, %v38_v7  ;;  %v64_v25 = vstv %s62_s7 }
  0x2b   :  { %p141_p3 = pnand %p140_p2, %p134_p13 }
  0x2c   :  { %v42_v9 = vmul.f32 %v41_v8, %v35_v5 }
  0x2e   :  { %v43_v11 = vsub.f32 %v42_v9, %v37_v4 }
  0x30   :  { %v46_v12 = vadd.f32 %v45_v10, %v43_v11 }
  0x32   :  { %v47_v13 = vmul.f32 %v46_v12, %v35_v5 }
  0x34   :  { %v48_v15 = vsub.f32 %v47_v13, %v41_v8 }
  0x36   :  { %v51_v16 = vadd.f32 %v50_v14, %v48_v15 }
  0x38   :  { %v52_v17 = vmul.f32 %v51_v16, %v35_v5 }
  0x3a   :  { %v53_v19 = vsub.f32 %v52_v17, %v46_v12 }
  0x3c   :  { %v56_v20 = vadd.f32 %v55_v18, %v53_v19 }
  0x3e   :  { %v57_v21 = vmul.f32 %v56_v20, %v35_v5 }
  0x40   :  { %v58_v23 = vsub.f32 %v57_v21, %v51_v16 }
  0x42   :  { %v61_v24 = vadd.f32 %v60_v22, %v58_v23 }
  0x44   :  { %v63_v26 = vmul.f32 %v87_v3, %v61_v24 }
  0x46   :  { %v65_v27 = vadd.f32 %v64_v25, %v63_v26 }
  0x48   :  { %v66_v28 = vsub.f32 %v65_v27, %v56_v20 }
  0x4a   :  { %v67_v29 = vmul.f32 0.5, %v66_v28 }
  0x4c   :  { %97 = vtanh.f32 %v67_v29 }
  0x56   :  { %v98_v30 = vpop.eup %97 }
  0x57   :  { %v69_v31 = vmul.f32 0.5, %v98_v30 }
  0x59   :  { %v70_v32 = vadd.f32 0.500001, %v69_v31 }
  0x5b   :  { %71 = vst [vmem:[#allocation8] sm:$0xff] %v70_v32 }
  0x5c   :  { %144 = shalt.err (!%p141_p3)
}
  0x5d   :  { %s145_s13 = scalar_lea.hbm %s217_s3, 128 }
  0x5e   :  { %p146_p4 = scmp.ne.s32.totalorder %s217_s3, %s145_s13  ;;  %p149_p5 = scmp.lt.u32.totalorder %s145_s13, %s217_s3 }
  0x60   :  { %p151_p6 = pnand %p149_p5, %p146_p4 }
  0x62   :  { %154 = shalt.err (!%p151_p6)
}
  0x63   :  { %81 = dma.vmem_to_hbm [thread:$0]  %s79_s9, 128, %s217_s3, [#allocation7]  }
  0x64   :  { %159 = dma.done.wait [#allocation7], 128  }
  0x65   :  { %160 = vsyncadd [#allocation7], 4294967168 }
  0x66   :  { %85 = vsyncpa [#allocation6], 1 }
  0x67   :  { %86 = vsyncpa [#allocation7], 1 }

</bundles_post_ra>
